<compile_context>
chip_gen: v6e
topology: v6e:2x2x1
jax: 0.10.0
libtpu: 0.0.40
codegen_flags: <defaults>
</compile_context>

<pallas_src>
import functools

import jax
import jax.numpy as jnp
from jax.experimental import pallas as pl
from jax.experimental.pallas import tpu as pltpu


def _pick_batch_tile(B, per_elem_bytes, *, budget_bytes=8 << 20, max_bt=32):
    """Batch elements per grid step.

    Keeps 2 * Bt * per_elem_bytes (double-buffered input block) under a VMEM
    budget that is safe for the default scoped limits of v5e (16 MiB) and
    v6e/v7x (32 MiB).  Prefers: the whole batch when it is small; otherwise a
    multiple of 8 that divides B (dense sublane tiles, grid >= 2 so megacore /
    v7x dual-TC sharding has independent work); otherwise 8 with the caller
    padding the batch.
    """
    cap = int(max(1, min(max_bt, budget_bytes // max(1, 2 * per_elem_bytes))))
    if B <= cap:
        half = B // 2
        if half >= 8 and B % half == 0:      # keep >= 2 grid steps (v7x: 2 TCs)
            return half
        return B
    bt = cap - cap % 8
    while bt >= 8:
        if B % bt == 0:
            return bt
        bt -= 8
    return min(8, cap)                        # caller pads B up to a multiple


def _output_layer_kernel(x_ref, w1_ref, w2_ref, w3_ref, b_ref, o_ref,
                         *, C, V, Bt, eps):
    """One batch tile (Bt elements) per grid step.

    x_ref : (Bt, C*T, V)   x_flat[b, c*T + k, v] == x_nchw[b, c, k, v]
    w1_ref: (2C, C*T)      fused GLU conv weights; identity residual folded
                           into the first C rows (the GLU "A" half)
    w2_ref: (C, C)         tconv_out 1x1 weights with identity folded (W2 + I)
    w3_ref: (1, C)         fc 1x1 weights
    b_ref : (3C + 1, 1)    stacked biases [b1 (2C) | b2 (C) | b3 (1)]
    o_ref : (Bt, 1, V)
    """
    # Loop-invariant operands: load/slice once per grid step (hoisted out of
    # the per-element loop).
    w1 = w1_ref[...]
    w2 = w2_ref[...]
    w3 = w3_ref[...]
    b_all = b_ref[...]
    b1 = b_all[0:2 * C]                       # (2C, 1)
    b2 = b_all[2 * C:3 * C]                   # (C, 1)
    b3 = b_all[3 * C:3 * C + 1]               # (1, 1)
    inv_n = 1.0 / float(V)

    def body(b, carry):
        x = x_ref[b]                                            # (C*T, V)

        # --- tconv_in: (Kt=T,1) conv as ONE fused matmul (contraction C*T)
        # for both GLU halves; identity residual already folded into w1[:C].
        ag = jnp.dot(w1, x, preferred_element_type=jnp.float32) + b1  # (2C, V)
        y1 = ag[:C] * jax.nn.sigmoid(ag[C:])                    # (C, V) f32

        # --- layer_norm over (T_out=1, V) per (batch, channel).
        # One-pass statistics: var = E[x^2] - E[x]^2 (population variance).
        s1 = jnp.sum(y1, axis=-1, keepdims=True)                # (C, 1)
        s2 = jnp.sum(y1 * y1, axis=-1, keepdims=True)           # (C, 1)
        mean = s1 * inv_n
        var = jnp.maximum(s2 * inv_n - mean * mean, 0.0)
        inv_std = pl.reciprocal(jnp.sqrt(var) + eps, approx=False)
        y2 = (y1 - mean) * inv_std                              # (C, V)

        # --- tconv_out: Kt=1, act_func='sigmoid' hits the module's ReLU
        # branch; identity residual folded -> relu((W2 + I) @ y2 + b2).
        y3 = jnp.maximum(
            jnp.dot(w2, y2, preferred_element_type=jnp.float32) + b2, 0.0)

        # --- fc: 1x1 conv C -> 1.
        out = jnp.dot(w3, y3, preferred_element_type=jnp.float32) + b3  # (1, V)
        o_ref[b] = out.astype(o_ref.dtype)
        return carry

    jax.lax.fori_loop(0, Bt, body, 0, unroll=True)


def output_layer(x_nchw, w1, b1, w2, b2, w3, b3, *, eps=1e-6, matmul_dtype=None):
    """OutputLayer forward.

    x_nchw : (B, C, T, V) float32, NCHW like the PyTorch module
    w1, b1 : tconv_in  Conv2d(C, 2C, (T,1)) weights (2C, C, T, 1) / bias (2C,)
    w2, b2 : tconv_out Conv2d(C,  C, (1,1)) weights (C, C, 1, 1)  / bias (C,)
    w3, b3 : fc        Conv2d(C,  1, (1,1)) weights (1, C, 1, 1)  / bias (1,)
    matmul_dtype : optional (e.g. jnp.bfloat16) dtype for x / w1 matmul inputs
    returns (B, 1, 1, V)
    """
    B, C, T, V = x_nchw.shape

    # (B, C, T, V) -> (B, C*T, V): pure reshape, V stays on the minor (lane)
    # axis.  No V padding: blocks use the full V extent.
    x_flat = x_nchw.reshape(B, C * T, V)

    # tconv_in weights flattened to (2C, C*T) with the same (c, k) ordering as
    # x_flat; identity residual folded into the GLU "A" rows.
    w1f = w1.reshape(2 * C, C * T)
    rows = jnp.arange(C)
    cols = rows * T + (T - 1)                     # column of x[:, c, T-1, :]
    w1f = w1f.at[rows, cols].add(jnp.asarray(1.0, w1f.dtype))

    # tconv_out: fold identity residual -> relu((W2 + I) y + b2).
    w2f = w2.reshape(C, C) + jnp.eye(C, dtype=w2.dtype)
    w3f = w3.reshape(1, C)

    # Consolidate all biases into a single small VMEM operand.
    b_all = jnp.concatenate([b1, b2, b3]).reshape(3 * C + 1, 1).astype(jnp.float32)

    if matmul_dtype is not None:
        x_flat = x_flat.astype(matmul_dtype)
        w1f = w1f.astype(matmul_dtype)

    elem_bytes = C * T * V * x_flat.dtype.itemsize
    Bt = _pick_batch_tile(B, elem_bytes)
    Bp = ((B + Bt - 1) // Bt) * Bt
    if Bp != B:                                   # rare: pad batch to tile mult
        x_flat = jnp.pad(x_flat, ((0, Bp - B), (0, 0), (0, 0)))

    kernel = functools.partial(_output_layer_kernel, C=C, V=V, Bt=Bt, eps=eps)

    out = pl.pallas_call(
        kernel,
        out_shape=jax.ShapeDtypeStruct((Bp, 1, V), x_nchw.dtype),
        grid_spec=pltpu.PrefetchScalarGridSpec(
            num_scalar_prefetch=0,
            grid=(Bp // Bt,),
            in_specs=[
                pl.BlockSpec((Bt, C * T, V), lambda n: (n, 0, 0)),
                pl.BlockSpec((2 * C, C * T), lambda n: (0, 0)),
                pl.BlockSpec((C, C), lambda n: (0, 0)),
                pl.BlockSpec((1, C), lambda n: (0, 0)),
                pl.BlockSpec((3 * C + 1, 1), lambda n: (0, 0)),
            ],
            out_specs=pl.BlockSpec((Bt, 1, V), lambda n: (n, 0, 0)),
        ),
        compiler_params=pltpu.CompilerParams(
            dimension_semantics=("parallel",)),
    )(x_flat, w1f, w2f, w3f, b_all)

    return out[:B].reshape(B, 1, 1, V)


def _reference_forward(x, w1, b1, w2, b2, w3, b3, *, eps=1e-6):
    """Plain-JAX reference mirroring the PyTorch OutputLayer forward."""
    B, C, T, V = x.shape
    dn = ('NCHW', 'OIHW', 'NCHW')
    # tconv_in: Kt=T, GLU, identity residual.
    xc = jax.lax.conv_general_dilated(x, w1, (1, 1), 'VALID',
                                      dimension_numbers=dn)
    xc = xc + b1.reshape(1, -1, 1, 1)
    x_in = x[:, :, T - 1:, :]
    y1 = (xc[:, :C] + x_in) * jax.nn.sigmoid(xc[:, C:])          # (B, C, 1, V)
    # layer_norm over dims (2, 3), population variance, (x-mean)/(std+eps).
    mean = jnp.mean(y1, axis=(2, 3), keepdims=True)
    var = jnp.var(y1, axis=(2, 3), keepdims=True)
    y2 = (y1 - mean) / (jnp.sqrt(var) + eps)
    # tconv_out: Kt=1, act='sigmoid' -> ReLU branch, identity residual.
    y3 = jax.lax.conv_general_dilated(y2, w2, (1, 1), 'VALID',
                                      dimension_numbers=dn)
    y3 = jnp.maximum(y3 + b2.reshape(1, -1, 1, 1) + y2, 0.0)
    # fc: 1x1 conv C -> 1.
    out = jax.lax.conv_general_dilated(y3, w3, (1, 1), 'VALID',
                                       dimension_numbers=dn)
    return out + b3.reshape(1, -1, 1, 1)                          # (B, 1, 1, V)


if __name__ == "__main__":
    # OutputLayer(T=8, channel=4, n=16) on a batch of 2.
    B, C, T, V = 2, 4, 8, 16

    key = jax.random.PRNGKey(0)
    ks = jax.random.split(key, 7)
    x = jax.random.normal(ks[0], (B, C, T, V), jnp.float32)
    w1 = jax.random.normal(ks[1], (2 * C, C, T, 1), jnp.float32) * 0.1
    b1 = jax.random.normal(ks[2], (2 * C,), jnp.float32) * 0.1
    w2 = jax.random.normal(ks[3], (C, C, 1, 1), jnp.float32) * 0.1
    b2 = jax.random.normal(ks[4], (C,), jnp.float32) * 0.1
    w3 = jax.random.normal(ks[5], (1, C, 1, 1), jnp.float32) * 0.1
    b3 = jax.random.normal(ks[6], (1,), jnp.float32) * 0.1

    out = output_layer(x, w1, b1, w2, b2, w3, b3)
    out = jax.block_until_ready(out)

    ref = _reference_forward(x, w1, b1, w2, b2, w3, b3)
    ref = jax.block_until_ready(ref)

    assert out.shape == (B, 1, 1, V), out.shape
    max_err = float(jnp.max(jnp.abs(out - ref)))
    assert jnp.allclose(out, ref, atol=1e-5, rtol=1e-5), max_err

    print("KERNEL_OK")
</pallas_src>

<mosaic_0001>
module attributes {stable_mosaic.version = 11 : i64} {
  func.func @_output_layer_kernel(%arg0: i32, %arg1: memref<2x32x16xf32, #tpu.memory_space<vmem>>, %arg2: memref<8x32xf32, #tpu.memory_space<vmem>>, %arg3: memref<4x4xf32, #tpu.memory_space<vmem>>, %arg4: memref<1x4xf32, #tpu.memory_space<vmem>>, %arg5: memref<13x1xf32, #tpu.memory_space<vmem>>, %arg6: memref<2x1x16xf32, #tpu.memory_space<vmem>>) attributes {dimension_semantics = [#tpu.dimension_semantics<parallel>], iteration_bounds = array<i64: 1>, scalar_prefetch = 0 : i64, scratch_operands = 0 : i64, tpu.core_type = #tpu.core_type<tc>, window_params = [{transform_indices = @transform_0, window_bounds = array<i64: 2, 32, 16>}, {pipeline_mode = #tpu.pipeline_mode<synchronous>, transform_indices = @transform_1, window_bounds = array<i64: 8, 32>}, {pipeline_mode = #tpu.pipeline_mode<synchronous>, transform_indices = @transform_2, window_bounds = array<i64: 4, 4>}, {pipeline_mode = #tpu.pipeline_mode<synchronous>, transform_indices = @transform_3, window_bounds = array<i64: 1, 4>}, {pipeline_mode = #tpu.pipeline_mode<synchronous>, transform_indices = @transform_4, window_bounds = array<i64: 13, 1>}, {transform_indices = @transform_5, window_bounds = array<i64: 2, 1, 16>}]} {
    %c0 = arith.constant 0 : index
    %c0_0 = arith.constant 0 : index
    %0 = vector.load %arg2[%c0, %c0_0] : memref<8x32xf32, #tpu.memory_space<vmem>>, vector<8x32xf32>
    %c0_1 = arith.constant 0 : index
    %c0_2 = arith.constant 0 : index
    %1 = vector.load %arg3[%c0_1, %c0_2] : memref<4x4xf32, #tpu.memory_space<vmem>>, vector<4x4xf32>
    %c0_3 = arith.constant 0 : index
    %c0_4 = arith.constant 0 : index
    %2 = vector.load %arg4[%c0_3, %c0_4] : memref<1x4xf32, #tpu.memory_space<vmem>>, vector<1x4xf32>
    %c0_5 = arith.constant 0 : index
    %c0_6 = arith.constant 0 : index
    %3 = vector.load %arg5[%c0_5, %c0_6] : memref<13x1xf32, #tpu.memory_space<vmem>>, vector<13x1xf32>
    %4 = vector.extract_strided_slice %3 {offsets = [0, 0], sizes = [8, 1], strides = [1, 1]} : vector<13x1xf32> to vector<8x1xf32>
    %5 = vector.extract_strided_slice %3 {offsets = [8, 0], sizes = [4, 1], strides = [1, 1]} : vector<13x1xf32> to vector<4x1xf32>
    %6 = vector.extract_strided_slice %3 {offsets = [12, 0], sizes = [1, 1], strides = [1, 1]} : vector<13x1xf32> to vector<1x1xf32>
    %c0_i32 = arith.constant 0 : i32
    %7 = arith.index_cast %c0_i32 : i32 to index
    %c0_7 = arith.constant 0 : index
    %c0_8 = arith.constant 0 : index
    %8 = vector.load %arg1[%7, %c0_7, %c0_8] : memref<2x32x16xf32, #tpu.memory_space<vmem>>, vector<1x32x16xf32>
    %9 = vector.shape_cast %8 : vector<1x32x16xf32> to vector<32x16xf32>
    %cst = arith.constant dense<0.000000e+00> : vector<8x16xf32>
    %10 = tpu.matmul %0, %9, %cst {dimension_numbers = #tpu.dot_dimension_numbers<[1], [0], [0], [1], [0, 0, 1, 1], [], []>} : vector<8x32xf32>, vector<32x16xf32>, vector<8x16xf32> -> vector<8x16xf32>
    %11 = vector.broadcast %4 : vector<8x1xf32> to vector<8x16xf32>
    %12 = arith.addf %10, %11 : vector<8x16xf32>
    %13 = vector.extract_strided_slice %12 {offsets = [0, 0], sizes = [4, 16], strides = [1, 1]} : vector<8x16xf32> to vector<4x16xf32>
    %14 = vector.extract_strided_slice %12 {offsets = [4, 0], sizes = [4, 16], strides = [1, 1]} : vector<8x16xf32> to vector<4x16xf32>
    %15 = arith.negf %14 : vector<4x16xf32>
    %16 = math.exp %15 : vector<4x16xf32>
    %cst_9 = arith.constant 1.000000e+00 : f32
    %17 = vector.broadcast %cst_9 : f32 to vector<4x16xf32>
    %18 = arith.addf %17, %16 : vector<4x16xf32>
    %19 = arith.divf %17, %18 : vector<4x16xf32>
    %20 = arith.mulf %13, %19 : vector<4x16xf32>
    %cst_10 = arith.constant dense<0.000000e+00> : vector<4xf32>
    %21 = vector.multi_reduction <add>, %20, %cst_10 [1] : vector<4x16xf32> to vector<4xf32>
    %22 = vector.shape_cast %21 : vector<4xf32> to vector<4x1xf32>
    %23 = arith.mulf %20, %20 : vector<4x16xf32>
    %cst_11 = arith.constant dense<0.000000e+00> : vector<4xf32>
    %24 = vector.multi_reduction <add>, %23, %cst_11 [1] : vector<4x16xf32> to vector<4xf32>
    %25 = vector.shape_cast %24 : vector<4xf32> to vector<4x1xf32>
    %cst_12 = arith.constant 6.250000e-02 : f32
    %26 = vector.broadcast %cst_12 : f32 to vector<4x1xf32>
    %27 = arith.mulf %22, %26 : vector<4x1xf32>
    %cst_13 = arith.constant 6.250000e-02 : f32
    %28 = vector.broadcast %cst_13 : f32 to vector<4x1xf32>
    %29 = arith.mulf %25, %28 : vector<4x1xf32>
    %30 = arith.mulf %27, %27 : vector<4x1xf32>
    %31 = arith.subf %29, %30 : vector<4x1xf32>
    %cst_14 = arith.constant 0.000000e+00 : f32
    %32 = vector.broadcast %cst_14 : f32 to vector<4x1xf32>
    %33 = arith.maximumf %31, %32 : vector<4x1xf32>
    %34 = math.sqrt %33 : vector<4x1xf32>
    %cst_15 = arith.constant 9.99999997E-7 : f32
    %35 = vector.broadcast %cst_15 : f32 to vector<4x1xf32>
    %36 = arith.addf %34, %35 : vector<4x1xf32>
    %37 = tpu.reciprocal %36 : vector<4x1xf32> -> vector<4x1xf32>
    %38 = vector.broadcast %27 : vector<4x1xf32> to vector<4x16xf32>
    %39 = arith.subf %20, %38 : vector<4x16xf32>
    %40 = vector.broadcast %37 : vector<4x1xf32> to vector<4x16xf32>
    %41 = arith.mulf %39, %40 : vector<4x16xf32>
    %cst_16 = arith.constant dense<0.000000e+00> : vector<4x16xf32>
    %42 = tpu.matmul %1, %41, %cst_16 {dimension_numbers = #tpu.dot_dimension_numbers<[1], [0], [0], [1], [0, 0, 1, 1], [], []>} : vector<4x4xf32>, vector<4x16xf32>, vector<4x16xf32> -> vector<4x16xf32>
    %43 = vector.broadcast %5 : vector<4x1xf32> to vector<4x16xf32>
    %44 = arith.addf %42, %43 : vector<4x16xf32>
    %cst_17 = arith.constant 0.000000e+00 : f32
    %45 = vector.broadcast %cst_17 : f32 to vector<4x16xf32>
    %46 = arith.maximumf %44, %45 : vector<4x16xf32>
    %cst_18 = arith.constant dense<0.000000e+00> : vector<1x16xf32>
    %47 = tpu.matmul %2, %46, %cst_18 {dimension_numbers = #tpu.dot_dimension_numbers<[1], [0], [0], [1], [0, 0, 1, 1], [], []>} : vector<1x4xf32>, vector<4x16xf32>, vector<1x16xf32> -> vector<1x16xf32>
    %48 = vector.broadcast %6 : vector<1x1xf32> to vector<1x16xf32>
    %49 = arith.addf %47, %48 : vector<1x16xf32>
    %50 = arith.index_cast %c0_i32 : i32 to index
    %c0_19 = arith.constant 0 : index
    %c0_20 = arith.constant 0 : index
    %51 = vector.load %arg6[%50, %c0_19, %c0_20] : memref<2x1x16xf32, #tpu.memory_space<vmem>>, vector<1x1x16xf32>
    %52 = vector.shape_cast %51 : vector<1x1x16xf32> to vector<1x16xf32>
    %53 = vector.shape_cast %49 : vector<1x16xf32> to vector<1x1x16xf32>
    tpu.vector_store %arg6[%50, %c0_19, %c0_20], %53 {strides = array<i32>} : memref<2x1x16xf32, #tpu.memory_space<vmem>>, vector<1x1x16xf32>,
    %c1_i32 = arith.constant 1 : i32
    %54 = arith.index_cast %c1_i32 : i32 to index
    %c0_21 = arith.constant 0 : index
    %c0_22 = arith.constant 0 : index
    %55 = vector.load %arg1[%54, %c0_21, %c0_22] : memref<2x32x16xf32, #tpu.memory_space<vmem>>, vector<1x32x16xf32>
    %56 = vector.shape_cast %55 : vector<1x32x16xf32> to vector<32x16xf32>
    %cst_23 = arith.constant dense<0.000000e+00> : vector<8x16xf32>
    %57 = tpu.matmul %0, %56, %cst_23 {dimension_numbers = #tpu.dot_dimension_numbers<[1], [0], [0], [1], [0, 0, 1, 1], [], []>} : vector<8x32xf32>, vector<32x16xf32>, vector<8x16xf32> -> vector<8x16xf32>
    %58 = vector.broadcast %4 : vector<8x1xf32> to vector<8x16xf32>
    %59 = arith.addf %57, %58 : vector<8x16xf32>
    %60 = vector.extract_strided_slice %59 {offsets = [0, 0], sizes = [4, 16], strides = [1, 1]} : vector<8x16xf32> to vector<4x16xf32>
    %61 = vector.extract_strided_slice %59 {offsets = [4, 0], sizes = [4, 16], strides = [1, 1]} : vector<8x16xf32> to vector<4x16xf32>
    %62 = arith.negf %61 : vector<4x16xf32>
    %63 = math.exp %62 : vector<4x16xf32>
    %cst_24 = arith.constant 1.000000e+00 : f32
    %64 = vector.broadcast %cst_24 : f32 to vector<4x16xf32>
    %65 = arith.addf %64, %63 : vector<4x16xf32>
    %66 = arith.divf %64, %65 : vector<4x16xf32>
    %67 = arith.mulf %60, %66 : vector<4x16xf32>
    %cst_25 = arith.constant dense<0.000000e+00> : vector<4xf32>
    %68 = vector.multi_reduction <add>, %67, %cst_25 [1] : vector<4x16xf32> to vector<4xf32>
    %69 = vector.shape_cast %68 : vector<4xf32> to vector<4x1xf32>
    %70 = arith.mulf %67, %67 : vector<4x16xf32>
    %cst_26 = arith.constant dense<0.000000e+00> : vector<4xf32>
    %71 = vector.multi_reduction <add>, %70, %cst_26 [1] : vector<4x16xf32> to vector<4xf32>
    %72 = vector.shape_cast %71 : vector<4xf32> to vector<4x1xf32>
    %cst_27 = arith.constant 6.250000e-02 : f32
    %73 = vector.broadcast %cst_27 : f32 to vector<4x1xf32>
    %74 = arith.mulf %69, %73 : vector<4x1xf32>
    %cst_28 = arith.constant 6.250000e-02 : f32
    %75 = vector.broadcast %cst_28 : f32 to vector<4x1xf32>
    %76 = arith.mulf %72, %75 : vector<4x1xf32>
    %77 = arith.mulf %74, %74 : vector<4x1xf32>
    %78 = arith.subf %76, %77 : vector<4x1xf32>
    %cst_29 = arith.constant 0.000000e+00 : f32
    %79 = vector.broadcast %cst_29 : f32 to vector<4x1xf32>
    %80 = arith.maximumf %78, %79 : vector<4x1xf32>
    %81 = math.sqrt %80 : vector<4x1xf32>
    %cst_30 = arith.constant 9.99999997E-7 : f32
    %82 = vector.broadcast %cst_30 : f32 to vector<4x1xf32>
    %83 = arith.addf %81, %82 : vector<4x1xf32>
    %84 = tpu.reciprocal %83 : vector<4x1xf32> -> vector<4x1xf32>
    %85 = vector.broadcast %74 : vector<4x1xf32> to vector<4x16xf32>
    %86 = arith.subf %67, %85 : vector<4x16xf32>
    %87 = vector.broadcast %84 : vector<4x1xf32> to vector<4x16xf32>
    %88 = arith.mulf %86, %87 : vector<4x16xf32>
    %cst_31 = arith.constant dense<0.000000e+00> : vector<4x16xf32>
    %89 = tpu.matmul %1, %88, %cst_31 {dimension_numbers = #tpu.dot_dimension_numbers<[1], [0], [0], [1], [0, 0, 1, 1], [], []>} : vector<4x4xf32>, vector<4x16xf32>, vector<4x16xf32> -> vector<4x16xf32>
    %90 = vector.broadcast %5 : vector<4x1xf32> to vector<4x16xf32>
    %91 = arith.addf %89, %90 : vector<4x16xf32>
    %cst_32 = arith.constant 0.000000e+00 : f32
    %92 = vector.broadcast %cst_32 : f32 to vector<4x16xf32>
    %93 = arith.maximumf %91, %92 : vector<4x16xf32>
    %cst_33 = arith.constant dense<0.000000e+00> : vector<1x16xf32>
    %94 = tpu.matmul %2, %93, %cst_33 {dimension_numbers = #tpu.dot_dimension_numbers<[1], [0], [0], [1], [0, 0, 1, 1], [], []>} : vector<1x4xf32>, vector<4x16xf32>, vector<1x16xf32> -> vector<1x16xf32>
    %95 = vector.broadcast %6 : vector<1x1xf32> to vector<1x16xf32>
    %96 = arith.addf %94, %95 : vector<1x16xf32>
    %97 = arith.index_cast %c1_i32 : i32 to index
    %c0_34 = arith.constant 0 : index
    %c0_35 = arith.constant 0 : index
    %98 = vector.load %arg6[%97, %c0_34, %c0_35] : memref<2x1x16xf32, #tpu.memory_space<vmem>>, vector<1x1x16xf32>
    %99 = vector.shape_cast %98 : vector<1x1x16xf32> to vector<1x16xf32>
    %100 = vector.shape_cast %96 : vector<1x16xf32> to vector<1x1x16xf32>
    tpu.vector_store %arg6[%97, %c0_34, %c0_35], %100 {strides = array<i32>} : memref<2x1x16xf32, #tpu.memory_space<vmem>>, vector<1x1x16xf32>,
    %c2_i32 = arith.constant 2 : i32
    return
  }
  func.func @transform_0(%arg0: i32) -> (i32, i32, i32) {
    %c0_i32 = arith.constant 0 : i32
    %c0_i32_0 = arith.constant 0 : i32
    %c0_i32_1 = arith.constant 0 : i32
    return %arg0, %c0_i32, %c0_i32_0 : i32, i32, i32
  }
  func.func @transform_1(%arg0: i32) -> (i32, i32) {
    %c0_i32 = arith.constant 0 : i32
    %c0_i32_0 = arith.constant 0 : i32
    %c0_i32_1 = arith.constant 0 : i32
    return %c0_i32, %c0_i32_0 : i32, i32
  }
  func.func @transform_2(%arg0: i32) -> (i32, i32) {
    %c0_i32 = arith.constant 0 : i32
    %c0_i32_0 = arith.constant 0 : i32
    %c0_i32_1 = arith.constant 0 : i32
    return %c0_i32, %c0_i32_0 : i32, i32
  }
  func.func @transform_3(%arg0: i32) -> (i32, i32) {
    %c0_i32 = arith.constant 0 : i32
    %c0_i32_0 = arith.constant 0 : i32
    %c0_i32_1 = arith.constant 0 : i32
    return %c0_i32, %c0_i32_0 : i32, i32
  }
  func.func @transform_4(%arg0: i32) -> (i32, i32) {
    %c0_i32 = arith.constant 0 : i32
    %c0_i32_0 = arith.constant 0 : i32
    %c0_i32_1 = arith.constant 0 : i32
    return %c0_i32, %c0_i32_0 : i32, i32
  }
  func.func @transform_5(%arg0: i32) -> (i32, i32, i32) {
    %c0_i32 = arith.constant 0 : i32
    %c0_i32_0 = arith.constant 0 : i32
    %c0_i32_1 = arith.constant 0 : i32
    return %arg0, %c0_i32, %c0_i32_0 : i32, i32, i32
  }
}

</mosaic_0001>

<bundles_post_ra>
// kernel: tpu_custom_call.1
= control target key start
LH: loop header
LB: loop body
LE: loop exit
PB: predicated region body
PF: predicated region fallthrough
CT: control target
= control target key end

     0   :  { %v702_v1 = vmov 0.0   ;;  %vm703_vm0 = vmmov 0   ;;  %v704_v4 = vmov 0   ;;  %s841_s0 = inlined_call_operand.vmem [shape: f32[2,32,16], index: 0, kind: input, shape index: {}]   ;;  %s842_s1 = inlined_call_operand.vmem [shape: f32[8,32], index: 1, kind: input, shape index: {}]   ;;  %s843_s2 = inlined_call_operand.vmem [shape: f32[4,4], index: 2, kind: input, shape index: {}]   ;;  %s844_s3 = inlined_call_operand.vmem [shape: f32[1,4], index: 3, kind: input, shape index: {}]   ;;  %s845_s4 = inlined_call_operand.vmem [shape: f32[13,1], index: 4, kind: input, shape index: {}]   ;;  %s846_s5 = inlined_call_operand.hbm [shape: f32[2,1,16], index: 5, kind: output, shape index: {}]  }
   0x1   :  { %v29_v0 = vld [vmem:[%s841_s0 + $0x18] sm:$0xff]  ;;  %614 = vmatprep.subr.mxu0 %v702_v1  ;;  %v28_v2 = vld [vmem:[%s841_s0 + $0x10] sm:$0xff]  ;;  %622 = vmatprep.mubr.msk.f32.mxu0 %vm703_vm0, %v702_v1  ;;  %v24_v3 = vld [vmem:[%s845_s4] sm:$0xff] }
   0x2   :  { %615 = vmatpush3.msra.mxu0 %v29_v0  ;;  %662 = vset.pattern.permute.xlu0 %v704_v4 }
   0x3   :  { %10 = vsyncpa [#allocation3], 0  ;;  %616 = vmatprep.subr.mxu0 %v702_v1  ;;  %v27_v5 = vld [vmem:[%s841_s0 + $0x8] sm:$0xff]  ;;  %32 = vperm.xlu0 %662, %v24_v3   ;;  %v26_v6 = vld [vmem:[%s841_s0] sm:$0xff]  ;;  %vm35_vm1 = vcmask 261120   ;;  %vm119_vm2 = vcmask 125952  }
   0x4   :  { %617 = vmatpush3.msra.mxu0 %v28_v2  ;;  %625 = vmatprep.subr.mxu1 %v702_v1  ;;  %v764_v7 = vld [vmem:[%s842_s1] sm:$0xff]  ;;  %v25_v21 = vld [vmem:[%s845_s4 + $0x8] sm:$0x1f]  ;;  %vm152_vm5 = vcmask 1043456   ;;  %vm148_vm6 = vcmask 31744   ;;  %v589_v45 = vld [vmem:[%s841_s0 + $0x38] sm:$0xff] }
   0x5   :  { %618 = vmatprep.subr.mxu0 %v702_v1  ;;  %627 = vmatprep.mubr.msk.f32.mxu1 %vm703_vm0, %v702_v1  ;;  %v783_v38 = vld [vmem:[%s843_s2] sm:$0xf]  ;;  %v588_v46 = vld [vmem:[%s841_s0 + $0x30] sm:$0xff]  ;;  %v587_v47 = vld [vmem:[%s841_s0 + $0x28] sm:$0xff]  ;;  %vm305_vm7 = vcmask 122880  }
   0x6   :  { %619 = vmatpush3.msra.mxu0 %v27_v5  ;;  %663 = vset.pattern.permute.xlu1 %v704_v4  ;;  %v797_v44 = vld [vmem:[%s844_s3] sm:$0x1] }
   0x7   :  { %620 = vmatprep.subr.mxu0 %v702_v1  ;;  %v586_v48 = vld [vmem:[%s841_s0 + $0x20] sm:$0xff]  ;;  %s705_s0 = smov [#allocation2]  }
   0x8   :  { %621 = vmatpush3.msra.mxu0 %v26_v6  ;;  %s569_s15 = sshll.u32 %s705_s0, 4  ;;  %s570_s15 = int_to_ptr.vmem [resolvable:$true] %s569_s15 }
   0x9   :  { %623 = vmatmul.mubr.msk.f32.vlgmr.msra.gmra.mxu0 %vm35_vm1, %v764_v7  ;;  %646 = vmatprep.subr.mxu0 %v702_v1  ;;  %s680_s16 = scalar_lea.vmem %s570_s15, 32  ;;  %p685_p1 = scmp.lt.s32.totalorder %s570_s15, %s570_s15 }
   0xa   :  { %648 = vmatprep.mubr.msk.f32.mxu0 %vm703_vm0, %v702_v1  ;;  %p681_p0 = scmp.ne.s32.totalorder %s570_s15, %s680_s16  ;;  %p686_p2 = scmp.lt.s32.totalorder %s680_s16, %s680_s16 }
   0xc   :  { %p687_p3 = por %p686_p2, %p685_p1 }
   0xe   :  { %p688_p4 = pnand %p687_p3, %p681_p0 }
  0x7e   :  { %v772_v8 = vpop.permute.xlu0 %32 }
  0xc9   :  { %v105_v9 = vpop.f32.mrf.mxu0 }
  0xca   :  { %v106_v10 = vadd.f32 %v105_v9, %v772_v8 }
  0xcb   :  { %v624_v11 = vpop.f32.mrf.mxu0 }
  0xcc   :  { %v581_v12 = vmul.f32 -1.442695, %v106_v10 }
  0xce   :  { %664 = vpow2.f32 %v581_v12 }
  0xdb   :  { %v665_v13 = vpop.eup %664 }
  0xdc   :  { %v112_v14 = vadd.f32 1.0, %v665_v13 }
  0xde   :  { %666 = vrcp.f32 %v112_v14 }
  0xeb   :  { %v667_v15 = vpop.eup %666 }
  0xec   :  { %v116_v16 = vrot.slane %v667_v15, 4 }
  0xee   :  { %v118_v17 = vmul.f32 %v116_v16, %v106_v10 }
  0xf0   :  { %v120_v18 = vsel %vm119_vm2, %v118_v17, 0.0  ;;  %v123_v19 = vmul.f32 %v118_v17, %v118_v17 }
  0xf1   :  { %121 = vadd.xlane.f32.xlu0 %v120_v18 }
  0xf2   :  { %v124_v20 = vsel %vm119_vm2, %v123_v19, 0.0 }
  0xf3   :  { %125 = vadd.xlane.f32.xlu1 %v124_v20 }
 0x104   :  { %145 = vperm.xlu1 %663, %v25_v21  }
 0x17a   :  { %v122_v22 = vpop.xlane.xlu0 %121 }
 0x17b   :  { %v127_v23 = vmul.f32 0.0625, %v122_v22 }
 0x17c   :  { %v126_v24 = vpop.xlane.xlu1 %125 }
 0x17d   :  { %v129_v25 = vmul.f32 %v127_v23, %v127_v23  ;;  %v128_v26 = vmul.f32 0.0625, %v126_v24  ;;  %v141_v35 = vsub.f32 %v118_v17, %v127_v23 }
 0x17f   :  { %v130_v27 = vsub.f32 %v128_v26, %v129_v25 }
 0x180   :  { %v791_v39 = vpop.permute.xlu1 %145 }
 0x181   :  { %v131_v28 = vmax.f32 %v130_v27, 0.0  ;;  %v227_v49 = vrot.slane %v791_v39, 4 }
 0x183   :  { %668 = vrsqrt.f32 %v131_v28  ;;  %vm134_vm3 = vcmp.eq.f32.partialorder %v131_v28, inf  ;;  %v137_v31 = vand.u32 2147483648, %v131_v28  ;;  %vm136_vm4 = vcmp.eq.f32.partialorder %v131_v28, 0.0 }
 0x190   :  { %v669_v29 = vpop.eup %668 }
 0x191   :  { %v133_v30 = vmul.f32 %v669_v29, %v131_v28 }
 0x193   :  { %v135_v32 = vsel %vm134_vm3, %v131_v28, %v133_v30 }
 0x194   :  { %v138_v33 = vsel %vm136_vm4, %v137_v31, %v135_v32 }
 0x195   :  { %v139_v34 = vadd.f32 1e-06, %v138_v33 }
 0x197   :  { %670 = vrcp.f32 %v139_v34 }
 0x1a4   :  { %v671_v36 = vpop.eup %670 }
 0x1a5   :  { %v142_v37 = vmul.f32 %v671_v36, %v141_v35 }
 0x1a7   :  { %626 = vmatpush3.msk.msra.mxu1 %vm152_vm5, %v142_v37 }
 0x1a8   :  { %628 = vmatmul.mubr.msk.f32.vlgmr.msra.gmra.mxu1 %vm148_vm6, %v783_v38  ;;  %630 = vmatprep.subr.mxu1 %v702_v1 }
 0x1a9   :  { %632 = vmatprep.mubr.msk.f32.mxu1 %vm703_vm0, %v702_v1 }
 0x268   :  { %v222_v40 = vpop.f32.mrf.mxu1 }
 0x269   :  { %v223_v41 = vadd.f32 %v222_v40, %v791_v39 }
 0x26a   :  { %v629_v42 = vpop.f32.mrf.mxu1 }
 0x26b   :  { %v226_v43 = vmax.f32 %v223_v41, 0.0 }
 0x26d   :  { %631 = vmatpush3.msk.msra.mxu1 %vm152_vm5, %v226_v43 }
 0x26e   :  { %633 = vmatmul.mubr.msk.f32.vlgmr.msra.gmra.mxu1 %vm148_vm6, %v797_v44  ;;  %635 = vmatprep.subr.mxu1 %v702_v1 }
 0x26f   :  { %636 = vmatpush3.msra.mxu1 %v589_v45  ;;  %643 = vmatprep.mubr.msk.f32.mxu1 %vm703_vm0, %v702_v1 }
 0x270   :  { %637 = vmatprep.subr.mxu1 %v702_v1 }
 0x271   :  { %638 = vmatpush3.msra.mxu1 %v588_v46 }
 0x272   :  { %639 = vmatprep.subr.mxu1 %v702_v1 }
 0x273   :  { %640 = vmatpush3.msra.mxu1 %v587_v47 }
 0x274   :  { %641 = vmatprep.subr.mxu1 %v702_v1 }
 0x275   :  { %642 = vmatpush3.msra.mxu1 %v586_v48 }
 0x276   :  { %644 = vmatmul.mubr.msk.f32.vlgmr.msra.gmra.mxu1 %vm35_vm1, %v764_v7 }
 0x32e   :  { %v301_v50 = vpop.f32.mrf.mxu1 }
 0x32f   :  { %v302_v51 = vadd.f32 %v301_v50, %v227_v49 }
 0x330   :  { %v634_v52 = vpop.f32.mrf.mxu1 }
 0x331   :  { %306 = vst.msk [vmem:[#allocation2] sm:$0x1] %vm305_vm7, %v302_v51 }
 0x336   :  { %v378_v53 = vpop.f32.mrf.mxu1 }
 0x337   :  { %v379_v54 = vadd.f32 %v378_v53, %v772_v8 }
 0x338   :  { %v645_v55 = vpop.f32.mrf.mxu1 }
 0x339   :  { %v591_v56 = vmul.f32 -1.442695, %v379_v54 }
 0x33b   :  { %672 = vpow2.f32 %v591_v56 }
 0x348   :  { %v673_v57 = vpop.eup %672 }
 0x349   :  { %v385_v58 = vadd.f32 1.0, %v673_v57 }
 0x34b   :  { %674 = vrcp.f32 %v385_v58 }
 0x358   :  { %v675_v59 = vpop.eup %674 }
 0x359   :  { %v389_v60 = vrot.slane %v675_v59, 4 }
 0x35b   :  { %v391_v61 = vmul.f32 %v389_v60, %v379_v54 }
 0x35d   :  { %v392_v62 = vsel %vm119_vm2, %v391_v61, 0.0  ;;  %v395_v63 = vmul.f32 %v391_v61, %v391_v61 }
 0x35e   :  { %393 = vadd.xlane.f32.xlu1 %v392_v62 }
 0x35f   :  { %v396_v0 = vsel %vm119_vm2, %v395_v63, 0.0 }
 0x360   :  { %397 = vadd.xlane.f32.xlu0 %v396_v0 }
 0x3e7   :  { %v394_v2 = vpop.xlane.xlu1 %393 }
 0x3e8   :  { %v399_v3 = vmul.f32 0.0625, %v394_v2 }
 0x3e9   :  { %v398_v4 = vpop.xlane.xlu0 %397 }
 0x3ea   :  { %v401_v5 = vmul.f32 %v399_v3, %v399_v3  ;;  %v400_v6 = vmul.f32 0.0625, %v398_v4  ;;  %v413_v15 = vsub.f32 %v391_v61, %v399_v3 }
 0x3ec   :  { %v402_v7 = vsub.f32 %v400_v6, %v401_v5 }
 0x3ee   :  { %v403_v8 = vmax.f32 %v402_v7, 0.0 }
 0x3f0   :  { %676 = vrsqrt.f32 %v403_v8  ;;  %vm406_vm8 = vcmp.eq.f32.partialorder %v403_v8, inf  ;;  %v409_v11 = vand.u32 2147483648, %v403_v8  ;;  %vm408_vm9 = vcmp.eq.f32.partialorder %v403_v8, 0.0 }
 0x3fd   :  { %v677_v9 = vpop.eup %676 }
 0x3fe   :  { %v405_v10 = vmul.f32 %v677_v9, %v403_v8 }
 0x400   :  { %v407_v12 = vsel %vm406_vm8, %v403_v8, %v405_v10 }
 0x401   :  { %v410_v13 = vsel %vm408_vm9, %v409_v11, %v407_v12 }
 0x402   :  { %v411_v14 = vadd.f32 1e-06, %v410_v13 }
 0x404   :  { %678 = vrcp.f32 %v411_v14 }
 0x411   :  { %v679_v16 = vpop.eup %678 }
 0x412   :  { %v414_v17 = vmul.f32 %v679_v16, %v413_v15 }
 0x414   :  { %647 = vmatpush3.msk.msra.mxu0 %vm152_vm5, %v414_v17 }
 0x415   :  { %649 = vmatmul.mubr.msk.f32.vlgmr.msra.gmra.mxu0 %vm148_vm6, %v783_v38  ;;  %651 = vmatprep.subr.mxu0 %v702_v1 }
 0x416   :  { %653 = vmatprep.mubr.msk.f32.mxu0 %vm703_vm0, %v702_v1 }
 0x4d5   :  { %v484_v18 = vpop.f32.mrf.mxu0 }
 0x4d6   :  { %v485_v19 = vadd.f32 %v484_v18, %v791_v39 }
 0x4d7   :  { %v650_v20 = vpop.f32.mrf.mxu0 }
 0x4d8   :  { %v488_v21 = vmax.f32 %v485_v19, 0.0 }
 0x4da   :  { %652 = vmatpush3.msk.msra.mxu0 %vm152_vm5, %v488_v21 }
 0x4db   :  { %654 = vmatmul.mubr.msk.f32.vlgmr.msra.gmra.mxu0 %vm148_vm6, %v797_v44 }
 0x59b   :  { %v558_v22 = vpop.f32.mrf.mxu0 }
 0x59c   :  { %v559_v23 = vadd.f32 %v558_v22, %v227_v49 }
 0x59d   :  { %v655_v24 = vpop.f32.mrf.mxu0 }
 0x59e   :  { %563 = vst.msk [vmem:[#allocation2 + $0x1] sm:$0x1] %vm305_vm7, %v559_v23 }
 0x59f   :  { %691 = shalt.err (!%p688_p4)
}
 0x5a0   :  { %s706_s17 = smov 16   ;;  %s707_s18 = smov 1  }
 0x5a1   :  { %575 = dma.vmem_to_hbm [thread:$0]  %s570_s15, 32, %s846_s5, [#allocation3], %s706_s17, %s706_s17, %s707_s18  }
 0x5a2   :  { %700 = dma.done.wait [#allocation3], 32  }
 0x5a3   :  { %701 = vsyncadd [#allocation3], 4294967264 }
 0x5a4   :  { %579 = vsyncpa [#allocation3], 1 }

</bundles_post_ra>
